<compile_context>
chip_gen: v6e
topology: v6e:2x2x1
jax: 0.10.0
libtpu: 0.0.40
codegen_flags: <defaults>
</compile_context>

<pallas_src>
import jax
import jax.numpy as jnp
from jax.experimental import pallas as pl
from jax.experimental.pallas import tpu as pltpu


def _round_up(x, m):
    return ((x + m - 1) // m) * m


# Conservative budgets that work on v5e / v6e / v7x (v7x has only 64 MiB VMEM).
_VMEM_BUDGET = 24 * 1024 * 1024        # target working set for tile selection
_VMEM_LIMIT = 40 * 1024 * 1024         # raised scoped limit (headroom everywhere)
_RESIDENT_W_BYTES = 8 * 1024 * 1024    # weight-resident fast-path threshold


# ----------------------------------------------------------------------------
# Kernel bodies
# ----------------------------------------------------------------------------
def _linear_bias_kernel(x_ref, w_ref, b_ref, o_ref):
    """Single-K-step: o = x @ W + b (no accumulator scratch)."""
    o_ref[...] = (
        jnp.dot(x_ref[...], w_ref[...], preferred_element_type=jnp.float32)
        + b_ref[...]
    ).astype(o_ref.dtype)


def _linear_acc_kernel(x_ref, w_ref, b_ref, o_ref, acc_ref):
    """K-streamed: f32 accumulator; bias folded into the k == 0 init."""
    k = pl.program_id(2)

    @pl.when(k == 0)
    def _():
        acc_ref[...] = jnp.broadcast_to(b_ref[...], acc_ref.shape)

    acc_ref[...] += jnp.dot(
        x_ref[...], w_ref[...], preferred_element_type=jnp.float32
    )

    @pl.when(k == pl.num_programs(2) - 1)
    def _():
        o_ref[...] = acc_ref[...].astype(o_ref.dtype)


# ----------------------------------------------------------------------------
# y = x @ W + b
# ----------------------------------------------------------------------------
def _linear_pallas(x_flat, w, b, *, compute_dtype=None):
    """x_flat: (M, K); w: (K, N); b: (N,). Returns (M, N) in x_flat.dtype."""
    M, K = x_flat.shape
    Kw, N = w.shape
    assert Kw == K, (Kw, K)
    out_dtype = x_flat.dtype

    # Optional MXU-friendly input dtype (f32 accumulation preserves accuracy).
    x_c = x_flat if compute_dtype is None else x_flat.astype(compute_dtype)
    w_c = w if compute_dtype is None else w.astype(compute_dtype)
    b_f32 = b.astype(jnp.float32).reshape(1, N)

    in_isz = jnp.dtype(x_c.dtype).itemsize
    out_isz = jnp.dtype(out_dtype).itemsize
    row_align = 16 if in_isz == 2 else 8

    # ---- K: unpadded when small or already lane-aligned; else round to 128.
    if K <= 128 or K % 128 == 0:
        Kp = K
    else:
        Kp = _round_up(K, 128)

    # ---- N: avoid output pad + slice whenever legal (full-dim block allowed).
    if N % 128 == 0 or N <= 2048:
        Np_res = N
    else:
        Np_res = _round_up(N, 128)

    def pick_tm(per_row_bytes, fixed_bytes, cap=512):
        tm = min(cap, _round_up(M, row_align))
        avail = max(_VMEM_BUDGET - fixed_bytes, 0)
        while tm > row_align and tm * per_row_bytes > avail:
            tm = max(row_align, _round_up(tm // 2, row_align))
        return tm

    w_vmem_bytes = Kp * Np_res * in_isz
    use_resident = w_vmem_bytes <= _RESIDENT_W_BYTES

    if use_resident:
        # ------------------ weight-resident fast path (1-D grid over M) -----
        Np = Np_res
        # x tile + out tile double-buffered; weight counted at 2 bufs (safe).
        per_row = 2 * Kp * in_isz + 2 * Np * out_isz
        fixed = 2 * w_vmem_bytes + 2 * Np * 4
        tm = pick_tm(per_row, fixed)
        Mp = _round_up(M, tm)

        x_p = x_c
        if (Mp, Kp) != (M, K):
            x_p = jnp.zeros((Mp, Kp), x_c.dtype).at[:M, :K].set(x_c)
        w_p = w_c
        if (Kp, Np) != (K, N):
            w_p = jnp.zeros((Kp, Np), w_c.dtype).at[:K, :N].set(w_c)
        b_p = b_f32
        if Np != N:
            b_p = jnp.zeros((1, Np), jnp.float32).at[:, :N].set(b_f32)

        cost = pl.CostEstimate(
            flops=2 * M * K * N,
            transcendentals=0,
            bytes_accessed=(M * K + K * N) * in_isz + M * N * out_isz + N * 4,
        )

        y_p = pl.pallas_call(
            _linear_bias_kernel,
            out_shape=jax.ShapeDtypeStruct((Mp, Np), out_dtype),
            grid_spec=pltpu.PrefetchScalarGridSpec(
                num_scalar_prefetch=0,
                grid=(Mp // tm,),
                in_specs=[
                    pl.BlockSpec((tm, Kp), lambda i: (i, 0)),   # x row tile
                    pl.BlockSpec((Kp, Np), lambda i: (0, 0)),   # resident weight
                    pl.BlockSpec((1, Np), lambda i: (0, 0)),    # resident bias
                ],
                out_specs=pl.BlockSpec((tm, Np), lambda i: (i, 0)),
            ),
            compiler_params=pltpu.CompilerParams(
                dimension_semantics=("parallel",),
                vmem_limit_bytes=_VMEM_LIMIT,
            ),
            cost_estimate=cost,
        )(x_p, w_p, b_p)

    else:
        # ------------------ tiled fallback (weight too big for VMEM) --------
        if N % 256 == 0:
            tn, Np = 256, N
        elif N % 128 == 0:
            tn, Np = 128, N
        else:
            Np = _round_up(N, 128)
            tn = 256 if Np % 256 == 0 else 128

        if Kp <= 1024:
            tk = Kp
        elif Kp % 512 == 0:
            tk = 512
        elif Kp % 256 == 0:
            tk = 256
        else:
            tk = 128
        num_k = Kp // tk

        # x/w/out double-buffered + f32 accumulator (only when num_k > 1).
        acc_bytes = tn * 4 if num_k > 1 else 0
        per_row = 2 * tk * in_isz + 2 * tn * out_isz + acc_bytes
        fixed = 2 * tk * tn * in_isz + 2 * tn * 4
        tm = pick_tm(per_row, fixed)
        Mp = _round_up(M, tm)

        x_p = x_c
        if (Mp, Kp) != (M, K):
            x_p = jnp.zeros((Mp, Kp), x_c.dtype).at[:M, :K].set(x_c)
        w_p = w_c
        if (Kp, Np) != (K, N):
            w_p = jnp.zeros((Kp, Np), w_c.dtype).at[:K, :N].set(w_c)
        b_p = b_f32
        if Np != N:
            b_p = jnp.zeros((1, Np), jnp.float32).at[:, :N].set(b_f32)

        cost = pl.CostEstimate(
            flops=2 * M * K * N,
            transcendentals=0,
            bytes_accessed=(M * K + K * N) * in_isz + M * N * out_isz + N * 4,
        )

        if num_k == 1:
            # Single-K-step: no accumulator scratch, 2-D grid.
            y_p = pl.pallas_call(
                _linear_bias_kernel,
                out_shape=jax.ShapeDtypeStruct((Mp, Np), out_dtype),
                grid_spec=pltpu.PrefetchScalarGridSpec(
                    num_scalar_prefetch=0,
                    grid=(Mp // tm, Np // tn),
                    in_specs=[
                        pl.BlockSpec((tm, tk), lambda i, j: (i, 0)),
                        pl.BlockSpec((tk, tn), lambda i, j: (0, j)),
                        pl.BlockSpec((1, tn), lambda i, j: (0, j)),
                    ],
                    out_specs=pl.BlockSpec((tm, tn), lambda i, j: (i, j)),
                ),
                compiler_params=pltpu.CompilerParams(
                    dimension_semantics=("parallel", "parallel"),
                    vmem_limit_bytes=_VMEM_LIMIT,
                ),
                cost_estimate=cost,
            )(x_p, w_p, b_p)
        else:
            y_p = pl.pallas_call(
                _linear_acc_kernel,
                out_shape=jax.ShapeDtypeStruct((Mp, Np), out_dtype),
                grid_spec=pltpu.PrefetchScalarGridSpec(
                    num_scalar_prefetch=0,
                    grid=(Mp // tm, Np // tn, num_k),
                    in_specs=[
                        pl.BlockSpec((tm, tk), lambda i, j, k: (i, k)),
                        pl.BlockSpec((tk, tn), lambda i, j, k: (k, j)),
                        pl.BlockSpec((1, tn), lambda i, j, k: (0, j)),
                    ],
                    out_specs=pl.BlockSpec((tm, tn), lambda i, j, k: (i, j)),
                    scratch_shapes=[pltpu.VMEM((tm, tn), jnp.float32)],
                ),
                compiler_params=pltpu.CompilerParams(
                    dimension_semantics=("parallel", "parallel", "arbitrary"),
                    vmem_limit_bytes=_VMEM_LIMIT,
                ),
                cost_estimate=cost,
            )(x_p, w_p, b_p)

    # Slice off padding only when padding actually happened.
    if y_p.shape != (M, N):
        y_p = y_p[:M, :N]
    return y_p


# ----------------------------------------------------------------------------
# TimeDistributed wrapper (reshape glue stays in plain JAX).
# ----------------------------------------------------------------------------
def time_distributed_linear(x, w, b, *, batch_first=False, compute_dtype=None):
    """Apply Linear(w, b) independently at each time step, matching
    PyTorch TimeDistributed.forward semantics exactly.

    For production on v6e/v7x prefer compute_dtype=jnp.bfloat16 (bf16 MXU feed
    with f32 accumulation); the default keeps the exact f32 path."""
    if x.ndim <= 2:
        x2 = x if x.ndim == 2 else x.reshape(1, -1)
        y = _linear_pallas(x2, w, b, compute_dtype=compute_dtype)
        return y if x.ndim == 2 else y.reshape(-1)

    x_reshape = x.reshape(-1, x.shape[-1])
    y = _linear_pallas(x_reshape, w, b, compute_dtype=compute_dtype)

    n_out = y.shape[-1]
    if batch_first:
        return y.reshape(x.shape[0], -1, n_out)
    return y.reshape(-1, x.shape[1], n_out)


# ----------------------------------------------------------------------------
# main: deterministic params + input, run once, verify against pure-JAX ref.
# ----------------------------------------------------------------------------
if __name__ == "__main__":
    key = jax.random.PRNGKey(0)
    k_x, k_w, k_b = jax.random.split(key, 3)

    seq, batch, f_in, f_out = 8, 2, 16, 32

    # nn.Linear(f_in, f_out) parameters. PyTorch stores weight as (f_out, f_in);
    # we keep (f_in, f_out) so the kernel computes x @ W (== x @ weight.T).
    bound = 1.0 / (f_in ** 0.5)
    w = jax.random.uniform(k_w, (f_in, f_out), jnp.float32, -bound, bound)
    b = jax.random.uniform(k_b, (f_out,), jnp.float32, -bound, bound)

    # input: (T, B, F_in), batch_first=False (PyTorch default here)
    x = jax.random.normal(k_x, (seq, batch, f_in), jnp.float32)

    y = time_distributed_linear(x, w, b, batch_first=False)
    y = jax.block_until_ready(y)

    # reference (pure JAX) check
    y_ref = (x.reshape(-1, f_in) @ w + b).reshape(-1, x.shape[1], f_out)
    assert y.shape == (seq, batch, f_out), y.shape
    assert jnp.allclose(y, y_ref, atol=1e-5, rtol=1e-5)

    # batch_first=True path
    y_bf = time_distributed_linear(x, w, b, batch_first=True)
    y_bf = jax.block_until_ready(y_bf)
    assert y_bf.shape == (seq, batch, f_out)
    assert jnp.allclose(
        y_bf, (x.reshape(-1, f_in) @ w + b).reshape(seq, -1, f_out),
        atol=1e-5, rtol=1e-5)

    # ndim <= 2 paths (PyTorch applies the module directly)
    y2d = time_distributed_linear(x[0], w, b)            # (B, F_in) -> (B, F_out)
    y1d = time_distributed_linear(x[0, 0], w, b)         # (F_in,)  -> (F_out,)
    jax.block_until_ready((y2d, y1d))
    assert jnp.allclose(y2d, x[0] @ w + b, atol=1e-5, rtol=1e-5)
    assert jnp.allclose(y1d, x[0, 0] @ w + b, atol=1e-5, rtol=1e-5)

    # ragged M (exercises the pad + slice fallback path)
    xr = jax.random.normal(k_x, (5, 3, f_in), jnp.float32)
    yr = time_distributed_linear(xr, w, b)
    yr = jax.block_until_ready(yr)
    yr_ref = (xr.reshape(-1, f_in) @ w + b).reshape(-1, 3, f_out)
    assert jnp.allclose(yr, yr_ref, atol=1e-5, rtol=1e-5)

    print("KERNEL_OK")
</pallas_src>

<mosaic_0001>
module attributes {stable_mosaic.version = 11 : i64} {
  func.func @_linear_bias_kernel(%arg0: i32, %arg1: memref<16x16xf32, #tpu.memory_space<vmem>>, %arg2: memref<16x32xf32, #tpu.memory_space<vmem>>, %arg3: memref<1x32xf32, #tpu.memory_space<vmem>>, %arg4: memref<16x32xf32, #tpu.memory_space<vmem>>) attributes {dimension_semantics = [#tpu.dimension_semantics<parallel>], iteration_bounds = array<i64: 1>, scalar_prefetch = 0 : i64, scratch_operands = 0 : i64, tpu.core_type = #tpu.core_type<tc>, window_params = [{transform_indices = @transform_0, window_bounds = array<i64: 16, 16>}, {pipeline_mode = #tpu.pipeline_mode<synchronous>, transform_indices = @transform_1, window_bounds = array<i64: 16, 32>}, {pipeline_mode = #tpu.pipeline_mode<synchronous>, transform_indices = @transform_2, window_bounds = array<i64: 1, 32>}, {transform_indices = @transform_3, window_bounds = array<i64: 16, 32>}]} {
    %c0 = arith.constant 0 : index
    %c0_0 = arith.constant 0 : index
    %0 = vector.load %arg1[%c0, %c0_0] : memref<16x16xf32, #tpu.memory_space<vmem>>, vector<16x16xf32>
    %c0_1 = arith.constant 0 : index
    %c0_2 = arith.constant 0 : index
    %1 = vector.load %arg2[%c0_1, %c0_2] : memref<16x32xf32, #tpu.memory_space<vmem>>, vector<16x32xf32>
    %cst = arith.constant dense<0.000000e+00> : vector<16x32xf32>
    %2 = tpu.matmul %0, %1, %cst {dimension_numbers = #tpu.dot_dimension_numbers<[1], [0], [0], [1], [0, 0, 1, 1], [], []>} : vector<16x16xf32>, vector<16x32xf32>, vector<16x32xf32> -> vector<16x32xf32>
    %c0_3 = arith.constant 0 : index
    %c0_4 = arith.constant 0 : index
    %3 = vector.load %arg3[%c0_3, %c0_4] : memref<1x32xf32, #tpu.memory_space<vmem>>, vector<1x32xf32>
    %4 = vector.broadcast %3 : vector<1x32xf32> to vector<16x32xf32>
    %5 = arith.addf %2, %4 : vector<16x32xf32>
    %c0_5 = arith.constant 0 : index
    %c0_6 = arith.constant 0 : index
    %6 = vector.load %arg4[%c0_5, %c0_6] : memref<16x32xf32, #tpu.memory_space<vmem>>, vector<16x32xf32>
    tpu.vector_store %arg4[%c0_5, %c0_6], %5 {strides = array<i32>} : memref<16x32xf32, #tpu.memory_space<vmem>>, vector<16x32xf32>,
    return
  }
  func.func @transform_0(%arg0: i32) -> (i32, i32) {
    %c0_i32 = arith.constant 0 : i32
    %c0_i32_0 = arith.constant 0 : i32
    return %arg0, %c0_i32 : i32, i32
  }
  func.func @transform_1(%arg0: i32) -> (i32, i32) {
    %c0_i32 = arith.constant 0 : i32
    %c0_i32_0 = arith.constant 0 : i32
    %c0_i32_1 = arith.constant 0 : i32
    return %c0_i32, %c0_i32_0 : i32, i32
  }
  func.func @transform_2(%arg0: i32) -> (i32, i32) {
    %c0_i32 = arith.constant 0 : i32
    %c0_i32_0 = arith.constant 0 : i32
    %c0_i32_1 = arith.constant 0 : i32
    return %c0_i32, %c0_i32_0 : i32, i32
  }
  func.func @transform_3(%arg0: i32) -> (i32, i32) {
    %c0_i32 = arith.constant 0 : i32
    %c0_i32_0 = arith.constant 0 : i32
    return %arg0, %c0_i32 : i32, i32
  }
}

</mosaic_0001>

<bundles_post_ra>
// kernel: tpu_custom_call.1
= control target key start
LH: loop header
LB: loop body
LE: loop exit
PB: predicated region body
PF: predicated region fallthrough
CT: control target
= control target key end

     0   :  { %8 = vsyncpa [#allocation3], 0  ;;  %s288_s0 = inlined_call_operand.hbm [shape: f32[16,16], index: 0, kind: input, shape index: {}]   ;;  %s289_s1 = inlined_call_operand.hbm [shape: f32[16,32], index: 1, kind: input, shape index: {}]   ;;  %s290_s2 = inlined_call_operand.vmem [shape: f32[1,32], index: 2, kind: input, shape index: {}]   ;;  %s291_s3 = inlined_call_operand.hbm [shape: f32[16,32], index: 3, kind: output, shape index: {}]  }
   0x1   :  { %9 = vsyncpa [#allocation6], 0 }
   0x2   :  { %10 = vsyncpa [#allocation4], 0  ;;  %s242_s12 = smov [#allocation2]  }
   0x3   :  { %s16_s13 = sshll.u32 %s242_s12, 4  ;;  %s17_s13 = int_to_ptr.vmem [resolvable:$true] %s16_s13 }
   0x4   :  { %s184_s14 = scalar_lea.vmem %s17_s13, 256  ;;  %p189_p1 = scmp.lt.s32.totalorder %s17_s13, %s17_s13 }
   0x5   :  { %p185_p0 = scmp.ne.s32.totalorder %s17_s13, %s184_s14  ;;  %p190_p2 = scmp.lt.s32.totalorder %s184_s14, %s184_s14 }
   0x7   :  { %p191_p3 = por %p190_p2, %p189_p1 }
   0x9   :  { %p192_p4 = pnand %p191_p3, %p185_p0 }
   0xb   :  { %195 = shalt.err (!%p192_p4)
}
   0xc   :  { %s243_s15 = smov 128   ;;  %s244_s16 = smov 8  }
   0xd   :  { %22 = dma.hbm_to_vmem [thread:$0]  %s288_s0, 256, %s17_s13, [#allocation3], %s243_s15, %s243_s15, %s244_s16  }
   0xe   :  { %s245_s19 = smov [#allocation5]  }
   0xf   :  { %s28_s20 = sshll.u32 %s245_s19, 4  ;;  %s29_s20 = int_to_ptr.vmem [resolvable:$true] %s28_s20 }
  0x10   :  { %s204_s21 = scalar_lea.vmem %s29_s20, 256  ;;  %p209_p6 = scmp.lt.s32.totalorder %s29_s20, %s29_s20 }
  0x11   :  { %p205_p5 = scmp.ne.s32.totalorder %s29_s20, %s204_s21  ;;  %p210_p7 = scmp.lt.s32.totalorder %s204_s21, %s204_s21 }
  0x13   :  { %p211_p8 = por %p210_p7, %p209_p6 }
  0x15   :  { %p212_p9 = pnand %p211_p8, %p205_p5 }
  0x17   :  { %215 = shalt.err (!%p212_p9)
}
  0x18   :  { %34 = dma.hbm_to_vmem [thread:$0]  %s289_s1, 256, %s29_s20, [#allocation6], %s243_s15, %s243_s15, %s244_s16  }
  0x19   :  { %236 = dma.done.wait [#allocation3], 256  }
  0x1a   :  { %237 = vsyncadd [#allocation3], 4294967040 }
  0x1b   :  { %238 = dma.done.wait [#allocation6], 256  }
  0x1c   :  { %239 = vsyncadd [#allocation6], 4294967040  ;;  %vm54_vm0 = vcmask 130048   ;;  %v46_v0 = vld [vmem:[#allocation5 + $0x8] sm:$0xff]  ;;  %v45_v1 = vld [vmem:[#allocation5] sm:$0xff]  ;;  %vm136_vm1 = vcmask 261120  }
  0x1d   :  { %v43_v2 = vld [vmem:[#allocation2] sm:$0xff]  ;;  %164 = vmatprep.subr.mxu0 %v46_v0  ;;  %v44_v3 = vld [vmem:[#allocation2 + $0x8] sm:$0xff]  ;;  %s246_s1 = smov [#allocation7]  }
  0x1e   :  { %168 = vmatprep.mubr.msk.f32.mxu0 %vm54_vm0, %v43_v2  ;;  %165 = vmatpush3.msra.mxu0 %v46_v0  ;;  %v157_v4 = vld [vmem:[%s290_s2] ss:$0 sm:$0xff]  ;;  %s144_s25 = sshll.u32 %s246_s1, 4  ;;  %s145_s25 = int_to_ptr.vmem [resolvable:$true] %s144_s25 }
  0x1f   :  { %166 = vmatprep.subr.mxu0 %v45_v1  ;;  %s216_s26 = scalar_lea.vmem %s145_s25, 256  ;;  %p221_p11 = scmp.lt.s32.totalorder %s145_s25, %s145_s25 }
  0x20   :  { %167 = vmatpush3.msra.mxu0 %v45_v1  ;;  %p217_p10 = scmp.ne.s32.totalorder %s145_s25, %s216_s26  ;;  %p222_p12 = scmp.lt.s32.totalorder %s216_s26, %s216_s26 }
  0x21   :  { %169 = vmatmul.mubr.msk.f32.vlgmr.msra.gmra.mxu0 %vm54_vm0, %v44_v3 }
  0x22   :  { %p223_p13 = por %p222_p12, %p221_p11 }
  0x24   :  { %p224_p0 = pnand %p223_p13, %p217_p10 }
  0xe1   :  { %v170_v5 = vpop.f32.mrf.mxu0 }
  0xe2   :  { %v133_v6 = vadd.f32 %v170_v5, %v157_v4 }
  0xe3   :  { %v127_v7 = vpop.f32.mrf.mxu0 }
  0xe4   :  { %v128_v8 = vadd.f32 %v157_v4, %v127_v7  ;;  %138 = vst.msk [vmem:[#allocation7 + $0x8] sm:$0xff] %vm136_vm1, %v133_v6 }
  0xe6   :  { %137 = vst.msk [vmem:[#allocation7] sm:$0xff] %vm136_vm1, %v128_v8 }
  0xe7   :  { %227 = shalt.err (!%p224_p0)
}
  0xe8   :  { %150 = dma.vmem_to_hbm [thread:$0]  %s145_s25, 256, %s291_s3, [#allocation4], %s243_s15, %s243_s15, %s244_s16  }
  0xe9   :  { %240 = dma.done.wait [#allocation4], 256  }
  0xea   :  { %241 = vsyncadd [#allocation4], 4294967040 }
  0xeb   :  { %154 = vsyncpa [#allocation3], 1 }
  0xec   :  { %155 = vsyncpa [#allocation6], 1 }
  0xed   :  { %156 = vsyncpa [#allocation4], 1 }

</bundles_post_ra>
